<compile_context>
chip_gen: v7x
topology: tpu7x:2x2x1
jax: 0.10.0
libtpu: 0.0.40
codegen_flags: <defaults>
</compile_context>

<pallas_src>
import jax
import jax.numpy as jnp
from jax.experimental import pallas as pl
from jax.experimental.pallas import tpu as pltpu


# ----------------------------------------------------------------------------
# Kernel
# ----------------------------------------------------------------------------
def _make_kernel(c_dim, has_sc0, n_blocks):
    """Build the kernel for a given config.

    Weight-ref order (after p_ref):
      fc_pos_w, fc_pos_b,
      b0_fc0_w, b0_fc0_b, b0_fc1_w, b0_fc1_b, [b0_sc_w if has_sc0],
      then per 2c-input block: fc0_w_lo, fc0_w_hi, fc0_b, fc1_w, fc1_b,
                               sc_w_lo, sc_w_hi
    Last ref is the output.
    """

    def kernel(p_ref, *refs):
        out_ref = refs[-1]
        it = iter(refs[:-1])
        ld = lambda: next(it)[...]

        relu = jax.nn.relu

        def dot(a, w):
            # MXU matmul: cast the activation to the (possibly bf16) weight
            # dtype, accumulate in f32.
            return jnp.dot(a.astype(w.dtype), w,
                           preferred_element_type=jnp.float32)

        BT, T, Dp = p_ref.shape
        M = BT * T

        p = p_ref[...].reshape(M, Dp)                       # (M, Dpad)

        # ---- fc_pos: Dpad -> 64 ------------------------------------------
        wp = ld(); bp = ld()
        net = dot(p, wp) + bp                               # (M, 64) f32

        # ---- block_0: ResnetBlockFC(64, c_dim) ----------------------------
        w00 = ld(); b00 = ld(); w01 = ld(); b01 = ld()
        h = dot(relu(net), w00) + b00
        dx = dot(relu(h), w01) + b01
        if has_sc0:
            ws0 = ld()
            net = dot(net, ws0) + dx
        else:
            net = net + dx                                  # (M, c)

        # ---- blocks with implicit cat([net, pooled]) input ---------------
        # relu(cat([net, pooled])) @ W == relu(net) @ W_lo + relu(pooled) @ W_hi
        # cat([net, pooled]) @ Ws    ==      net  @ Ws_lo +      pooled  @ Ws_hi
        # TODO(synk): if nlevel grows large, stack per-block weights into
        # (n_blocks, ...) arrays and run this as a lax.fori_loop.
        for _ in range(n_blocks):
            net3 = net.reshape(BT, T, c_dim)
            pooled = jnp.max(net3, axis=1)                  # (BT, c)

            w0a = ld(); w0b = ld(); b0 = ld()
            w1 = ld(); b1 = ld()
            wsa = ld(); wsb = ld()

            h_pool = dot(relu(pooled), w0b) + b0            # (BT, c)
            h = dot(relu(net), w0a).reshape(BT, T, c_dim) + h_pool[:, None, :]
            h = h.reshape(M, c_dim)
            dx = dot(relu(h), w1) + b1                      # (M, c)

            xs_pool = dot(pooled, wsb)                      # (BT, c)
            xs = dot(net, wsa).reshape(BT, T, c_dim) + xs_pool[:, None, :]
            xs = xs.reshape(M, c_dim)

            net = xs + dx                                   # (M, c)

        # ---- final pool + concat: (BT, T, 2c), lane-dense store -----------
        net3 = net.reshape(BT, T, c_dim)
        pooled = jnp.max(net3, axis=1)                      # (BT, c)
        pooled_b = jnp.broadcast_to(pooled[:, None, :], (BT, T, c_dim))
        out = jnp.concatenate([net3, pooled_b], axis=-1)    # (BT, T, 2c)
        out_ref[...] = out.astype(out_ref.dtype)

    return kernel


# ----------------------------------------------------------------------------
# Wrapper
# ----------------------------------------------------------------------------
def _pick_bt(B, T, target_rows=4096):
    """Largest divisor of B with BT*T <= ~target_rows; keep >=2 grid steps
    whenever B allows it (so both v7x TensorCores get work)."""
    divisors = [d for d in range(1, B + 1) if B % d == 0]
    cap = max(1, target_rows // max(T, 1))
    cands = [d for d in divisors if d <= cap and (B // d) >= 2]
    if not cands:
        cands = [d for d in divisors if d <= cap]
    if not cands:
        cands = [1]
    return max(cands)


def res_pn_forward(p, params, *, bt=None, mxu_dtype=jnp.bfloat16):
    """p: (B, N, D) float32. Returns (B, N, out_dim) per-point features."""
    B, T, D = p.shape
    c = params["b0_fc1_w"].shape[1]
    h0 = params["b0_fc0_w"].shape[1]
    out_dim = 2 * c
    has_sc0 = "b0_sc_w" in params
    blocks = params["blocks"]
    n_blocks = len(blocks)

    # Pad the point count to a multiple of 8 by replicating the last point so
    # the (M,c)<->(BT,T,c) reshapes around each pool stay sublane-preserving
    # and padded rows can never win the max-pool (duplicates don't change max).
    # TODO(synk): very large N (single batch, >~8K points) would need a T-tiled
    # grid with a two-pass running-max pool; not implemented here.
    T_pad = ((T + 7) // 8) * 8
    p_in = p.astype(jnp.float32)
    if T_pad != T:
        pad = jnp.broadcast_to(p_in[:, T - 1:T, :], (B, T_pad - T, D))
        p_in = jnp.concatenate([p_in, pad], axis=1)

    # Pad tiny point-channel dim D to 8 (zero rows in W => identical result).
    D_pad = max(D, 8)
    wp = params["fc_pos_w"]
    if D_pad != D:
        p_in = jnp.pad(p_in, ((0, 0), (0, 0), (0, D_pad - D)))
        wp = jnp.pad(wp, ((0, D_pad - D), (0, 0)))

    # Weight matrices -> MXU dtype (bf16 by default); biases stay f32 since
    # they are added post-accumulation on the VPU.
    w_mat = lambda w: w.astype(mxu_dtype)
    w_bias = lambda b: b.reshape(1, -1).astype(jnp.float32)

    weight_args = [w_mat(wp), w_bias(params["fc_pos_b"]),
                   w_mat(params["b0_fc0_w"]), w_bias(params["b0_fc0_b"]),
                   w_mat(params["b0_fc1_w"]), w_bias(params["b0_fc1_b"])]
    if has_sc0:
        weight_args.append(w_mat(params["b0_sc_w"]))
    for blk in blocks:
        w0, ws = blk["fc0_w"], blk["sc_w"]
        weight_args += [w_mat(w0[:c]), w_mat(w0[c:]), w_bias(blk["fc0_b"]),
                        w_mat(blk["fc1_w"]), w_bias(blk["fc1_b"]),
                        w_mat(ws[:c]), w_mat(ws[c:])]

    bt = _pick_bt(B, T_pad) if bt is None else bt
    assert B % bt == 0, "batch tile must divide B"
    grid = (B // bt,)
    rows = bt * T_pad

    # Explicit scoped-VMEM budget: ~3 KiB/row f32 working set (p + 2c-wide out,
    # both double-buffered, plus activation temps) + headroom; cap below v7x's
    # 64 MiB physical VMEM.
    vmem_limit = int(min(56 * 2**20, max(24 * 2**20, rows * 3 * 1024 + (4 << 20))))

    # Advisory cost estimate for the XLA scheduler.
    m = B * T_pad
    flops = 2 * m * D_pad * 64 + 2 * m * (64 * h0 + h0 * c)
    if has_sc0:
        flops += 2 * m * 64 * c
    flops += n_blocks * (2 * m * 3 * c * c + 4 * B * c * c)
    bytes_w = sum(int(a.size) * a.dtype.itemsize for a in weight_args)
    bytes_acc = int(p_in.size * 4 + m * out_dim * 4 + bytes_w)
    cost = pl.CostEstimate(flops=int(flops), transcendentals=0,
                           bytes_accessed=bytes_acc)

    def full(a):
        nd = a.ndim
        return pl.BlockSpec(a.shape, lambda b: (0,) * nd)

    in_specs = [pl.BlockSpec((bt, T_pad, D_pad), lambda b: (b, 0, 0))]
    in_specs += [full(a) for a in weight_args]
    out_specs = pl.BlockSpec((bt, T_pad, out_dim), lambda b: (b, 0, 0))

    kernel = _make_kernel(c, has_sc0, n_blocks)

    out = pl.pallas_call(
        kernel,
        out_shape=jax.ShapeDtypeStruct((B, T_pad, out_dim), jnp.float32),
        grid_spec=pltpu.PrefetchScalarGridSpec(
            num_scalar_prefetch=0,
            grid=grid,
            in_specs=in_specs,
            out_specs=out_specs,
        ),
        compiler_params=pltpu.CompilerParams(
            dimension_semantics=("parallel",),
            vmem_limit_bytes=vmem_limit),
        cost_estimate=cost,
    )(p_in, *weight_args)

    if T_pad != T:
        out = out[:, :T, :]
    return out


# ----------------------------------------------------------------------------
# Parameters & pure-JAX reference
# ----------------------------------------------------------------------------
def init_params(key, out_dim=128, dim=3, nlevel=2):
    """Synthetic params; shapes mirror ResPNLayer.__init__ (weights as (in, out))."""
    assert nlevel >= 2
    c = out_dim // 2
    h0 = min(64, c)

    def draw(shape):
        nonlocal key
        key, sub = jax.random.split(key)
        return (0.1 * jax.random.normal(sub, shape)).astype(jnp.float32)

    params = {
        "fc_pos_w": draw((dim, 64)), "fc_pos_b": draw((64,)),
        "b0_fc0_w": draw((64, h0)), "b0_fc0_b": draw((h0,)),
        "b0_fc1_w": draw((h0, c)), "b0_fc1_b": draw((c,)),
    }
    if c != 64:
        params["b0_sc_w"] = draw((64, c))
    blocks = []
    for _ in range(nlevel - 1):                  # block_1 + (nlevel-2) extras
        blocks.append({
            "fc0_w": draw((2 * c, c)), "fc0_b": draw((c,)),
            "fc1_w": draw((c, c)), "fc1_b": draw((c,)),
            "sc_w": draw((2 * c, c)),
        })
    params["blocks"] = blocks
    return params


def _reference_forward(p, params):
    """Pure-JAX (f32) mirror of the PyTorch forward, for the correctness check."""
    relu = jax.nn.relu

    def res_block(x, w0, b0, w1, b1, sc=None):
        net = relu(x) @ w0 + b0
        dx = relu(net) @ w1 + b1
        xs = x @ sc if sc is not None else x
        return xs + dx

    net = p @ params["fc_pos_w"] + params["fc_pos_b"]
    net = res_block(net, params["b0_fc0_w"], params["b0_fc0_b"],
                    params["b0_fc1_w"], params["b0_fc1_b"],
                    params.get("b0_sc_w"))
    for blk in params["blocks"]:
        pooled = jnp.max(net, axis=1, keepdims=True)
        x = jnp.concatenate([net, jnp.broadcast_to(pooled, net.shape)], axis=2)
        net = res_block(x, blk["fc0_w"], blk["fc0_b"],
                        blk["fc1_w"], blk["fc1_b"], blk["sc_w"])
    pooled = jnp.max(net, axis=1, keepdims=True)
    return jnp.concatenate([net, jnp.broadcast_to(pooled, net.shape)], axis=2)


# ----------------------------------------------------------------------------
if __name__ == "__main__":
    out_dim, nlevel = 128, 2     # module defaults -> c_dim = 64
    key = jax.random.PRNGKey(0)
    key, pkey1, pkey2 = jax.random.split(key, 3)
    params = init_params(key, out_dim=out_dim, dim=3, nlevel=nlevel)

    # Case 1: B=2, N=8 (no point-count padding needed).
    p1 = jax.random.normal(pkey1, (2, 8, 3), dtype=jnp.float32)
    ref1 = _reference_forward(p1, params)

    # f32-MXU variant: tight check against the pure-JAX reference.
    out_f32 = jax.block_until_ready(
        res_pn_forward(p1, params, mxu_dtype=jnp.float32))
    assert out_f32.shape == (2, 8, out_dim)
    assert jnp.allclose(out_f32, ref1, atol=1e-3, rtol=1e-3)

    # Default bf16-operand variant (f32 accumulate): looser tolerance.
    out_bf16 = jax.block_until_ready(res_pn_forward(p1, params))
    assert out_bf16.shape == (2, 8, out_dim)
    assert jnp.allclose(out_bf16, ref1, atol=2e-2, rtol=2e-2)

    # Case 2: N=10 (not a multiple of 8) exercises the replicate-pad path.
    p2 = jax.random.normal(pkey2, (2, 10, 3), dtype=jnp.float32)
    out2 = jax.block_until_ready(res_pn_forward(p2, params))
    ref2 = _reference_forward(p2, params)
    assert out2.shape == (2, 10, out_dim)
    assert jnp.allclose(out2, ref2, atol=2e-2, rtol=2e-2)

    print("KERNEL_OK")
</pallas_src>

<mosaic_0001>
module attributes {stable_mosaic.version = 11 : i64} {
  func.func @kernel(%arg0: i32, %arg1: memref<1x8x8xf32, #tpu.memory_space<vmem>>, %arg2: memref<8x64xf32, #tpu.memory_space<vmem>>, %arg3: memref<1x64xf32, #tpu.memory_space<vmem>>, %arg4: memref<64x64xf32, #tpu.memory_space<vmem>>, %arg5: memref<1x64xf32, #tpu.memory_space<vmem>>, %arg6: memref<64x64xf32, #tpu.memory_space<vmem>>, %arg7: memref<1x64xf32, #tpu.memory_space<vmem>>, %arg8: memref<64x64xf32, #tpu.memory_space<vmem>>, %arg9: memref<64x64xf32, #tpu.memory_space<vmem>>, %arg10: memref<1x64xf32, #tpu.memory_space<vmem>>, %arg11: memref<64x64xf32, #tpu.memory_space<vmem>>, %arg12: memref<1x64xf32, #tpu.memory_space<vmem>>, %arg13: memref<64x64xf32, #tpu.memory_space<vmem>>, %arg14: memref<64x64xf32, #tpu.memory_space<vmem>>, %arg15: memref<1x8x128xf32, #tpu.memory_space<vmem>>) attributes {dimension_semantics = [#tpu.dimension_semantics<parallel>], iteration_bounds = array<i64: 2>, scalar_prefetch = 0 : i64, scratch_operands = 0 : i64, tpu.core_type = #tpu.core_type<tc>, window_params = [{transform_indices = @transform_0, window_bounds = array<i64: 1, 8, 8>}, {pipeline_mode = #tpu.pipeline_mode<synchronous>, transform_indices = @transform_1, window_bounds = array<i64: 8, 64>}, {pipeline_mode = #tpu.pipeline_mode<synchronous>, transform_indices = @transform_2, window_bounds = array<i64: 1, 64>}, {pipeline_mode = #tpu.pipeline_mode<synchronous>, transform_indices = @transform_3, window_bounds = array<i64: 64, 64>}, {pipeline_mode = #tpu.pipeline_mode<synchronous>, transform_indices = @transform_4, window_bounds = array<i64: 1, 64>}, {pipeline_mode = #tpu.pipeline_mode<synchronous>, transform_indices = @transform_5, window_bounds = array<i64: 64, 64>}, {pipeline_mode = #tpu.pipeline_mode<synchronous>, transform_indices = @transform_6, window_bounds = array<i64: 1, 64>}, {pipeline_mode = #tpu.pipeline_mode<synchronous>, transform_indices = @transform_7, window_bounds = array<i64: 64, 64>}, {pipeline_mode = #tpu.pipeline_mode<synchronous>, transform_indices = @transform_8, window_bounds = array<i64: 64, 64>}, {pipeline_mode = #tpu.pipeline_mode<synchronous>, transform_indices = @transform_9, window_bounds = array<i64: 1, 64>}, {pipeline_mode = #tpu.pipeline_mode<synchronous>, transform_indices = @transform_10, window_bounds = array<i64: 64, 64>}, {pipeline_mode = #tpu.pipeline_mode<synchronous>, transform_indices = @transform_11, window_bounds = array<i64: 1, 64>}, {pipeline_mode = #tpu.pipeline_mode<synchronous>, transform_indices = @transform_12, window_bounds = array<i64: 64, 64>}, {pipeline_mode = #tpu.pipeline_mode<synchronous>, transform_indices = @transform_13, window_bounds = array<i64: 64, 64>}, {transform_indices = @transform_14, window_bounds = array<i64: 1, 8, 128>}]} {
    %c0 = arith.constant 0 : index
    %c0_0 = arith.constant 0 : index
    %c0_1 = arith.constant 0 : index
    %0 = vector.load %arg1[%c0, %c0_0, %c0_1] : memref<1x8x8xf32, #tpu.memory_space<vmem>>, vector<1x8x8xf32>
    %1 = vector.shape_cast %0 : vector<1x8x8xf32> to vector<8x8xf32>
    %c0_2 = arith.constant 0 : index
    %c0_3 = arith.constant 0 : index
    %2 = vector.load %arg2[%c0_2, %c0_3] : memref<8x64xf32, #tpu.memory_space<vmem>>, vector<8x64xf32>
    %c0_4 = arith.constant 0 : index
    %c0_5 = arith.constant 0 : index
    %3 = vector.load %arg3[%c0_4, %c0_5] : memref<1x64xf32, #tpu.memory_space<vmem>>, vector<1x64xf32>
    %cst = arith.constant dense<0.000000e+00> : vector<8x64xf32>
    %4 = tpu.matmul %1, %2, %cst {dimension_numbers = #tpu.dot_dimension_numbers<[1], [0], [0], [1], [0, 0, 1, 1], [], []>} : vector<8x8xf32>, vector<8x64xf32>, vector<8x64xf32> -> vector<8x64xf32>
    %5 = vector.broadcast %3 : vector<1x64xf32> to vector<8x64xf32>
    %6 = arith.addf %4, %5 : vector<8x64xf32>
    %c0_6 = arith.constant 0 : index
    %c0_7 = arith.constant 0 : index
    %7 = vector.load %arg4[%c0_6, %c0_7] : memref<64x64xf32, #tpu.memory_space<vmem>>, vector<64x64xf32>
    %c0_8 = arith.constant 0 : index
    %c0_9 = arith.constant 0 : index
    %8 = vector.load %arg5[%c0_8, %c0_9] : memref<1x64xf32, #tpu.memory_space<vmem>>, vector<1x64xf32>
    %c0_10 = arith.constant 0 : index
    %c0_11 = arith.constant 0 : index
    %9 = vector.load %arg6[%c0_10, %c0_11] : memref<64x64xf32, #tpu.memory_space<vmem>>, vector<64x64xf32>
    %c0_12 = arith.constant 0 : index
    %c0_13 = arith.constant 0 : index
    %10 = vector.load %arg7[%c0_12, %c0_13] : memref<1x64xf32, #tpu.memory_space<vmem>>, vector<1x64xf32>
    %cst_14 = arith.constant 0.000000e+00 : f32
    %11 = vector.broadcast %cst_14 : f32 to vector<8x64xf32>
    %12 = arith.maximumf %6, %11 : vector<8x64xf32>
    %cst_15 = arith.constant dense<0.000000e+00> : vector<8x64xf32>
    %13 = tpu.matmul %12, %7, %cst_15 {dimension_numbers = #tpu.dot_dimension_numbers<[1], [0], [0], [1], [0, 0, 1, 1], [], []>} : vector<8x64xf32>, vector<64x64xf32>, vector<8x64xf32> -> vector<8x64xf32>
    %14 = vector.broadcast %8 : vector<1x64xf32> to vector<8x64xf32>
    %15 = arith.addf %13, %14 : vector<8x64xf32>
    %cst_16 = arith.constant 0.000000e+00 : f32
    %16 = vector.broadcast %cst_16 : f32 to vector<8x64xf32>
    %17 = arith.maximumf %15, %16 : vector<8x64xf32>
    %cst_17 = arith.constant dense<0.000000e+00> : vector<8x64xf32>
    %18 = tpu.matmul %17, %9, %cst_17 {dimension_numbers = #tpu.dot_dimension_numbers<[1], [0], [0], [1], [0, 0, 1, 1], [], []>} : vector<8x64xf32>, vector<64x64xf32>, vector<8x64xf32> -> vector<8x64xf32>
    %19 = vector.broadcast %10 : vector<1x64xf32> to vector<8x64xf32>
    %20 = arith.addf %18, %19 : vector<8x64xf32>
    %21 = arith.addf %6, %20 : vector<8x64xf32>
    %22 = vector.shape_cast %21 : vector<8x64xf32> to vector<1x8x64xf32>
    %cst_18 = arith.constant dense<0xFF800000> : vector<1x64xf32>
    %23 = vector.multi_reduction <maximumf>, %22, %cst_18 [1] : vector<1x8x64xf32> to vector<1x64xf32>
    %c0_19 = arith.constant 0 : index
    %c0_20 = arith.constant 0 : index
    %24 = vector.load %arg8[%c0_19, %c0_20] : memref<64x64xf32, #tpu.memory_space<vmem>>, vector<64x64xf32>
    %c0_21 = arith.constant 0 : index
    %c0_22 = arith.constant 0 : index
    %25 = vector.load %arg9[%c0_21, %c0_22] : memref<64x64xf32, #tpu.memory_space<vmem>>, vector<64x64xf32>
    %c0_23 = arith.constant 0 : index
    %c0_24 = arith.constant 0 : index
    %26 = vector.load %arg10[%c0_23, %c0_24] : memref<1x64xf32, #tpu.memory_space<vmem>>, vector<1x64xf32>
    %c0_25 = arith.constant 0 : index
    %c0_26 = arith.constant 0 : index
    %27 = vector.load %arg11[%c0_25, %c0_26] : memref<64x64xf32, #tpu.memory_space<vmem>>, vector<64x64xf32>
    %c0_27 = arith.constant 0 : index
    %c0_28 = arith.constant 0 : index
    %28 = vector.load %arg12[%c0_27, %c0_28] : memref<1x64xf32, #tpu.memory_space<vmem>>, vector<1x64xf32>
    %c0_29 = arith.constant 0 : index
    %c0_30 = arith.constant 0 : index
    %29 = vector.load %arg13[%c0_29, %c0_30] : memref<64x64xf32, #tpu.memory_space<vmem>>, vector<64x64xf32>
    %c0_31 = arith.constant 0 : index
    %c0_32 = arith.constant 0 : index
    %30 = vector.load %arg14[%c0_31, %c0_32] : memref<64x64xf32, #tpu.memory_space<vmem>>, vector<64x64xf32>
    %cst_33 = arith.constant 0.000000e+00 : f32
    %31 = vector.broadcast %cst_33 : f32 to vector<1x64xf32>
    %32 = arith.maximumf %23, %31 : vector<1x64xf32>
    %cst_34 = arith.constant dense<0.000000e+00> : vector<1x64xf32>
    %33 = tpu.matmul %32, %25, %cst_34 {dimension_numbers = #tpu.dot_dimension_numbers<[1], [0], [0], [1], [0, 0, 1, 1], [], []>} : vector<1x64xf32>, vector<64x64xf32>, vector<1x64xf32> -> vector<1x64xf32>
    %34 = arith.addf %33, %26 : vector<1x64xf32>
    %cst_35 = arith.constant 0.000000e+00 : f32
    %35 = vector.broadcast %cst_35 : f32 to vector<8x64xf32>
    %36 = arith.maximumf %21, %35 : vector<8x64xf32>
    %cst_36 = arith.constant dense<0.000000e+00> : vector<8x64xf32>
    %37 = tpu.matmul %36, %24, %cst_36 {dimension_numbers = #tpu.dot_dimension_numbers<[1], [0], [0], [1], [0, 0, 1, 1], [], []>} : vector<8x64xf32>, vector<64x64xf32>, vector<8x64xf32> -> vector<8x64xf32>
    %38 = vector.shape_cast %37 : vector<8x64xf32> to vector<1x8x64xf32>
    %39 = vector.shape_cast %34 : vector<1x64xf32> to vector<1x1x64xf32>
    %40 = vector.broadcast %39 : vector<1x1x64xf32> to vector<1x8x64xf32>
    %41 = arith.addf %38, %40 : vector<1x8x64xf32>
    %42 = vector.shape_cast %41 : vector<1x8x64xf32> to vector<8x64xf32>
    %cst_37 = arith.constant 0.000000e+00 : f32
    %43 = vector.broadcast %cst_37 : f32 to vector<8x64xf32>
    %44 = arith.maximumf %42, %43 : vector<8x64xf32>
    %cst_38 = arith.constant dense<0.000000e+00> : vector<8x64xf32>
    %45 = tpu.matmul %44, %27, %cst_38 {dimension_numbers = #tpu.dot_dimension_numbers<[1], [0], [0], [1], [0, 0, 1, 1], [], []>} : vector<8x64xf32>, vector<64x64xf32>, vector<8x64xf32> -> vector<8x64xf32>
    %46 = vector.broadcast %28 : vector<1x64xf32> to vector<8x64xf32>
    %47 = arith.addf %45, %46 : vector<8x64xf32>
    %cst_39 = arith.constant dense<0.000000e+00> : vector<1x64xf32>
    %48 = tpu.matmul %23, %30, %cst_39 {dimension_numbers = #tpu.dot_dimension_numbers<[1], [0], [0], [1], [0, 0, 1, 1], [], []>} : vector<1x64xf32>, vector<64x64xf32>, vector<1x64xf32> -> vector<1x64xf32>
    %cst_40 = arith.constant dense<0.000000e+00> : vector<8x64xf32>
    %49 = tpu.matmul %21, %29, %cst_40 {dimension_numbers = #tpu.dot_dimension_numbers<[1], [0], [0], [1], [0, 0, 1, 1], [], []>} : vector<8x64xf32>, vector<64x64xf32>, vector<8x64xf32> -> vector<8x64xf32>
    %50 = vector.shape_cast %49 : vector<8x64xf32> to vector<1x8x64xf32>
    %51 = vector.shape_cast %48 : vector<1x64xf32> to vector<1x1x64xf32>
    %52 = vector.broadcast %51 : vector<1x1x64xf32> to vector<1x8x64xf32>
    %53 = arith.addf %50, %52 : vector<1x8x64xf32>
    %54 = vector.shape_cast %53 : vector<1x8x64xf32> to vector<8x64xf32>
    %55 = arith.addf %54, %47 : vector<8x64xf32>
    %56 = vector.shape_cast %55 : vector<8x64xf32> to vector<1x8x64xf32>
    %cst_41 = arith.constant dense<0xFF800000> : vector<1x64xf32>
    %57 = vector.multi_reduction <maximumf>, %56, %cst_41 [1] : vector<1x8x64xf32> to vector<1x64xf32>
    %58 = vector.shape_cast %57 : vector<1x64xf32> to vector<1x1x64xf32>
    %59 = vector.shape_cast %58 : vector<1x1x64xf32> to vector<1x1x64xf32>
    %60 = vector.broadcast %59 : vector<1x1x64xf32> to vector<1x8x64xf32>
    %61 = tpu.concatenate %56, %60 in 2 : vector<1x8x64xf32>, vector<1x8x64xf32> -> vector<1x8x128xf32>
    %c0_42 = arith.constant 0 : index
    %c0_43 = arith.constant 0 : index
    %c0_44 = arith.constant 0 : index
    %62 = vector.load %arg15[%c0_42, %c0_43, %c0_44] : memref<1x8x128xf32, #tpu.memory_space<vmem>>, vector<1x8x128xf32>
    tpu.vector_store %arg15[%c0_42, %c0_43, %c0_44], %61 {strides = array<i32>} : memref<1x8x128xf32, #tpu.memory_space<vmem>>, vector<1x8x128xf32>,
    return
  }
  func.func @transform_0(%arg0: i32) -> (i32, i32, i32) {
    %c0_i32 = arith.constant 0 : i32
    %c0_i32_0 = arith.constant 0 : i32
    %c0_i32_1 = arith.constant 0 : i32
    return %arg0, %c0_i32, %c0_i32_0 : i32, i32, i32
  }
  func.func @transform_1(%arg0: i32) -> (i32, i32) {
    %c0_i32 = arith.constant 0 : i32
    %c0_i32_0 = arith.constant 0 : i32
    %c0_i32_1 = arith.constant 0 : i32
    return %c0_i32, %c0_i32_0 : i32, i32
  }
  func.func @transform_2(%arg0: i32) -> (i32, i32) {
    %c0_i32 = arith.constant 0 : i32
    %c0_i32_0 = arith.constant 0 : i32
    %c0_i32_1 = arith.constant 0 : i32
    return %c0_i32, %c0_i32_0 : i32, i32
  }
  func.func @transform_3(%arg0: i32) -> (i32, i32) {
    %c0_i32 = arith.constant 0 : i32
    %c0_i32_0 = arith.constant 0 : i32
    %c0_i32_1 = arith.constant 0 : i32
    return %c0_i32, %c0_i32_0 : i32, i32
  }
  func.func @transform_4(%arg0: i32) -> (i32, i32) {
    %c0_i32 = arith.constant 0 : i32
    %c0_i32_0 = arith.constant 0 : i32
    %c0_i32_1 = arith.constant 0 : i32
    return %c0_i32, %c0_i32_0 : i32, i32
  }
  func.func @transform_5(%arg0: i32) -> (i32, i32) {
    %c0_i32 = arith.constant 0 : i32
    %c0_i32_0 = arith.constant 0 : i32
    %c0_i32_1 = arith.constant 0 : i32
    return %c0_i32, %c0_i32_0 : i32, i32
  }
  func.func @transform_6(%arg0: i32) -> (i32, i32) {
    %c0_i32 = arith.constant 0 : i32
    %c0_i32_0 = arith.constant 0 : i32
    %c0_i32_1 = arith.constant 0 : i32
    return %c0_i32, %c0_i32_0 : i32, i32
  }
  func.func @transform_7(%arg0: i32) -> (i32, i32) {
    %c0_i32 = arith.constant 0 : i32
    %c0_i32_0 = arith.constant 0 : i32
    %c0_i32_1 = arith.constant 0 : i32
    return %c0_i32, %c0_i32_0 : i32, i32
  }
  func.func @transform_8(%arg0: i32) -> (i32, i32) {
    %c0_i32 = arith.constant 0 : i32
    %c0_i32_0 = arith.constant 0 : i32
    %c0_i32_1 = arith.constant 0 : i32
    return %c0_i32, %c0_i32_0 : i32, i32
  }
  func.func @transform_9(%arg0: i32) -> (i32, i32) {
    %c0_i32 = arith.constant 0 : i32
    %c0_i32_0 = arith.constant 0 : i32
    %c0_i32_1 = arith.constant 0 : i32
    return %c0_i32, %c0_i32_0 : i32, i32
  }
  func.func @transform_10(%arg0: i32) -> (i32, i32) {
    %c0_i32 = arith.constant 0 : i32
    %c0_i32_0 = arith.constant 0 : i32
    %c0_i32_1 = arith.constant 0 : i32
    return %c0_i32, %c0_i32_0 : i32, i32
  }
  func.func @transform_11(%arg0: i32) -> (i32, i32) {
    %c0_i32 = arith.constant 0 : i32
    %c0_i32_0 = arith.constant 0 : i32
    %c0_i32_1 = arith.constant 0 : i32
    return %c0_i32, %c0_i32_0 : i32, i32
  }
  func.func @transform_12(%arg0: i32) -> (i32, i32) {
    %c0_i32 = arith.constant 0 : i32
    %c0_i32_0 = arith.constant 0 : i32
    %c0_i32_1 = arith.constant 0 : i32
    return %c0_i32, %c0_i32_0 : i32, i32
  }
  func.func @transform_13(%arg0: i32) -> (i32, i32) {
    %c0_i32 = arith.constant 0 : i32
    %c0_i32_0 = arith.constant 0 : i32
    %c0_i32_1 = arith.constant 0 : i32
    return %c0_i32, %c0_i32_0 : i32, i32
  }
  func.func @transform_14(%arg0: i32) -> (i32, i32, i32) {
    %c0_i32 = arith.constant 0 : i32
    %c0_i32_0 = arith.constant 0 : i32
    %c0_i32_1 = arith.constant 0 : i32
    return %arg0, %c0_i32, %c0_i32_0 : i32, i32, i32
  }
}

</mosaic_0001>

<bundles_post_ra>
// kernel: tpu_custom_call.1
= control target key start
LH: loop header
LB: loop body
LE: loop exit
PB: predicated region body
PF: predicated region fallthrough
CT: control target
= control target key end

     0   :  { %s2817_s0 = inlined_call_operand.hbm [shape: f32[2,8,8], index: 0, kind: input, shape index: {}]   ;;  %s2818_s1 = inlined_call_operand.hbm [shape: f32[8,64], index: 1, kind: input, shape index: {}]   ;;  %s2819_s2 = inlined_call_operand.vmem [shape: f32[1,64], index: 2, kind: input, shape index: {}]   ;;  %s2820_s3 = inlined_call_operand.hbm [shape: f32[64,64], index: 3, kind: input, shape index: {}]   ;;  %s2821_s4 = inlined_call_operand.vmem [shape: f32[1,64], index: 4, kind: input, shape index: {}]   ;;  %s2822_s5 = inlined_call_operand.hbm [shape: f32[64,64], index: 5, kind: input, shape index: {}]   ;;  %s2823_s6 = inlined_call_operand.vmem [shape: f32[1,64], index: 6, kind: input, shape index: {}]   ;;  %s2824_s7 = inlined_call_operand.hbm [shape: f32[64,64], index: 7, kind: input, shape index: {}]   ;;  %s2825_s8 = inlined_call_operand.hbm [shape: f32[64,64], index: 8, kind: input, shape index: {}]   ;;  %s2826_s9 = inlined_call_operand.vmem [shape: f32[1,64], index: 9, kind: input, shape index: {}]   ;;  %s2827_s10 = inlined_call_operand.hbm [shape: f32[64,64], index: 10, kind: input, shape index: {}]   ;;  %s2828_s11 = inlined_call_operand.vmem [shape: f32[1,64], index: 11, kind: input, shape index: {}]   ;;  %s2829_s12 = inlined_call_operand.hbm [shape: f32[64,64], index: 12, kind: input, shape index: {}]   ;;  %s2830_s13 = inlined_call_operand.hbm [shape: f32[64,64], index: 13, kind: input, shape index: {}]   ;;  %s2831_s14 = inlined_call_operand.hbm [shape: f32[2,8,128], index: 14, kind: output, shape index: {}]  }
   0x1   :  { %2836 = sst [smem:[#allocation24_spill]] %s2818_s1 }
   0x2   :  { %2837 = sst [smem:[#allocation25_spill]] %s2821_s4 }
   0x3   :  { %2838 = sst [smem:[#allocation26_spill]] %s2822_s5 }
   0x4   :  { %2839 = sst [smem:[#allocation27_spill]] %s2823_s6 }
   0x5   :  { %2840 = sst [smem:[#allocation28_spill]] %s2826_s9 }
   0x6   :  { %2841 = sst [smem:[#allocation29_spill]] %s2828_s11 }
   0x7   :  { %2842 = sst [smem:[#allocation30_spill]] %s2831_s14 }
   0x8   :  { %19 = vsyncpa [#allocation3], 0 }
   0x9   :  { %21 = vsyncpa [#allocation3 + $0x1], 0 }
   0xa   :  { %22 = vsyncpa [#allocation6], 0 }
   0xb   :  { %23 = vsyncpa [#allocation9], 0 }
   0xc   :  { %24 = vsyncpa [#allocation12], 0 }
   0xd   :  { %25 = vsyncpa [#allocation15], 0 }
   0xe   :  { %26 = vsyncpa [#allocation4], 0 }
   0xf   :  { %28 = vsyncpa [#allocation4 + $0x1], 0  ;;  %s2360_s29 = smov 0   ;;  %s2362_s30 = smov 0  }
  0x10   :  { %s2364_s15 = smov 0   ;;  %s2366_s16 = smov 0  }
  0x11 LB: > { %s2269_s17 = smov [#allocation5]   ;;  %s2381_s19 = sadd.s32 4294967295, %s2267_s16   ;;  %s2267_s16 = sphi %s2366_s16, %s2874_s16   ;;  %s2263_s15 = sphi %s2364_s15, %s2873_s15   ;;  %s2259_s30 = sphi %s2362_s30, %s2872_s30   ;;  %s2255_s29 = sphi %s2360_s29, %s2871_s29  }
  0x12   : > { %s377_s18 = sshll.u32 %s2269_s17, 4  ;;  %p1468_p0 = scmp.ge.s32.totalorder %s2267_s16, 1  ;;  %s378_s18 = int_to_ptr.vmem [resolvable:$true] %s377_s18 }
  0x13   : > { %p2833_p1 = scmp.eq.s32.totalorder %s2381_s19, 0  ;;  %p364_p2 = scmp.lt.s32.totalorder %s2267_s16, 3 }
  0x14   : > { %s2270_s21 = smov [#allocation8]   ;;  %s2271_s24 = smov [#allocation11]  }
  0x15   : > { %p2386_p3 = pnand %p1468_p0, %p364_p2  ;;  %s406_s22 = sshll.u32 %s2270_s21, 4  ;;  %s2399_s22 = int_to_ptr.vmem [resolvable:$true] %s406_s22 }
  0x16   : > { %s435_s25 = sshll.u32 %s2271_s24, 4  ;;  %s2845_s1 = sld [smem:[#allocation24_spill]]  ;;  %s2401_s25 = int_to_ptr.vmem [resolvable:$true] %s435_s25 }
  0x17   : > { %s2843_s20 = scalar_select %p2386_p3, 1, 0 }
  0x18   : > { %p1834_p5 = pneg %p2386_p3 }
  0x1a   : > { %p2395_p6 = pnand %p1834_p5, %p2833_p1 }
  0x1c   : > { %s1931_s28 = scalar_lea.hbm %s2845_s1, 128  ;;  %p2411_p8 = pneg %p2395_p6 }
  0x1d   : > { %p1932_p7 = scmp.ne.s32.totalorder %s2845_s1, %s1931_s28  ;;  %p1938_p11 = scmp.lt.u32.totalorder %s1931_s28, %s2845_s1 }
  0x1f   : > { %p1934_p9 = pnand %p2411_p8, %p1932_p7 }
  0x21   : > { %p1935_p10 = pneg %p1934_p9 }
  0x23   : > { %p1940_p12 = pnand %p1938_p11, %p1935_p10 }
  0x25   : > { %1943 = shalt.err (!%p1940_p12)
}
  0x26   : > { %s1944_s26 = scalar_lea.vmem %s378_s18, 128  ;;  %p1952_p5 = scmp.lt.s32.totalorder %s378_s18, %s378_s18 }
  0x27   : > { %p1945_p13 = scmp.ne.s32.totalorder %s378_s18, %s1944_s26  ;;  %p1953_p4 = scmp.lt.s32.totalorder %s1944_s26, %s1944_s26 }
  0x29   : > { %p1947_p0 = pnand %p1945_p13, %p2411_p8  ;;  %p1954_p1 = por %p1953_p4, %p1952_p5 }
  0x2b   : > { %p1948_p2 = pneg %p1947_p0 }
  0x2d   : > { %p1955_p3 = pnand %p1954_p1, %p1948_p2 }
  0x2f   : > { %1958 = shalt.err (!%p1955_p3)
}
  0x30   : > { %1837 = dma.hbm_to_vmem [thread:$0]  (!%p2395_p6), %s2845_s1, 128, %s378_s18, [#allocation6]  }
  0x31   : > { %s2847_s5 = sld [smem:[#allocation26_spill]] }
  0x37   : > { %s1959_s17 = scalar_lea.hbm %s2847_s5, 1024 }
  0x38   : > { %p1960_p7 = scmp.ne.s32.totalorder %s2847_s5, %s1959_s17  ;;  %p1966_p1 = scmp.lt.u32.totalorder %s1959_s17, %s2847_s5 }
  0x3a   : > { %p1962_p9 = pnand %p1960_p7, %p2411_p8 }
  0x3c   : > { %p1963_p4 = pneg %p1962_p9 }
  0x3e   : > { %p1968_p3 = pnand %p1966_p1, %p1963_p4 }
  0x40   : > { %1971 = shalt.err (!%p1968_p3)
}
  0x41   : > { %s1972_s18 = scalar_lea.vmem %s2399_s22, 1024  ;;  %p1980_p13 = scmp.lt.s32.totalorder %s2399_s22, %s2399_s22 }
  0x42   : > { %p1973_p10 = scmp.ne.s32.totalorder %s2399_s22, %s1972_s18  ;;  %p1981_p0 = scmp.lt.s32.totalorder %s1972_s18, %s1972_s18 }
  0x44   : > { %p1975_p11 = pnand %p1973_p10, %p2411_p8  ;;  %p1982_p2 = por %p1981_p0, %p1980_p13 }
  0x46   : > { %p1976_p12 = pneg %p1975_p11 }
  0x48   : > { %p1983_p5 = pnand %p1982_p2, %p1976_p12 }
  0x4a   : > { %1986 = shalt.err (!%p1983_p5)
}
  0x4b   : > { %s2272_s9 = smov 128   ;;  %s2273_s6 = smov 8  }
  0x4c   : > { %1843 = dma.hbm_to_vmem [thread:$0]  (!%p2395_p6), %s2847_s5, 1024, %s2399_s22, [#allocation9], %s2272_s9, %s2272_s9, %s2273_s6  }
  0x4d   : > { %s1987_s17 = scalar_lea.hbm %s2825_s8, 1024 }
  0x4e   : > { %p1988_p7 = scmp.ne.s32.totalorder %s2825_s8, %s1987_s17  ;;  %p1994_p1 = scmp.lt.u32.totalorder %s1987_s17, %s2825_s8 }
  0x50   : > { %p1990_p9 = pnand %p1988_p7, %p2411_p8 }
  0x52   : > { %p1991_p4 = pneg %p1990_p9 }
  0x54   : > { %p1996_p3 = pnand %p1994_p1, %p1991_p4 }
  0x56   : > { %1999 = shalt.err (!%p1996_p3)
}
  0x57   : > { %s2000_s22 = scalar_lea.vmem %s2401_s25, 1024  ;;  %p2008_p13 = scmp.lt.s32.totalorder %s2401_s25, %s2401_s25 }
  0x58   : > { %p2001_p10 = scmp.ne.s32.totalorder %s2401_s25, %s2000_s22  ;;  %p2009_p0 = scmp.lt.s32.totalorder %s2000_s22, %s2000_s22 }
  0x5a   : > { %p2003_p11 = pnand %p2001_p10, %p2411_p8  ;;  %p2010_p2 = por %p2009_p0, %p2008_p13 }
  0x5c   : > { %p2004_p12 = pneg %p2003_p11 }
  0x5e   : > { %p2011_p5 = pnand %p2010_p2, %p2004_p12 }
  0x60   : > { %2014 = shalt.err (!%p2011_p5)
}
  0x61   : > { %1849 = dma.hbm_to_vmem [thread:$0]  (!%p2395_p6), %s2825_s8, 1024, %s2401_s25, [#allocation12], %s2272_s9, %s2272_s9, %s2273_s6  }
  0x62   : > { %s2274_s27 = smov [#allocation14]   ;;  %s2275_s28 = smov [#allocation7]  }
  0x63   : > { %s467_s11 = sshll.u32 %s2274_s27, 4  ;;  %s390_s17 = sshll.u32 %s2275_s28, 4  ;;  %s468_s11 = int_to_ptr.vmem [resolvable:$true] %s467_s11  ;;  %s391_s17 = int_to_ptr.vmem [resolvable:$true] %s390_s17 }
  0x64   : > { %s2015_s18 = scalar_lea.hbm %s2829_s12, 1024 }
  0x65   : > { %p2016_p7 = scmp.ne.s32.totalorder %s2829_s12, %s2015_s18  ;;  %p2022_p1 = scmp.lt.u32.totalorder %s2015_s18, %s2829_s12 }
  0x67   : > { %p2018_p9 = pnand %p2016_p7, %p2411_p8 }
  0x69   : > { %p2019_p4 = pneg %p2018_p9 }
  0x6b   : > { %p2024_p3 = pnand %p2022_p1, %p2019_p4 }
  0x6d   : > { %2027 = shalt.err (!%p2024_p3)
}
  0x6e   : > { %s2028_s25 = scalar_lea.vmem %s468_s11, 1024  ;;  %p2036_p13 = scmp.lt.s32.totalorder %s468_s11, %s468_s11 }
  0x6f   : > { %p2029_p10 = scmp.ne.s32.totalorder %s468_s11, %s2028_s25  ;;  %p2037_p0 = scmp.lt.s32.totalorder %s2028_s25, %s2028_s25 }
  0x71   : > { %p2031_p11 = pnand %p2029_p10, %p2411_p8  ;;  %p2038_p2 = por %p2037_p0, %p2036_p13 }
  0x73   : > { %p2032_p12 = pneg %p2031_p11 }
  0x75   : > { %p2039_p5 = pnand %p2038_p2, %p2032_p12 }
  0x77   : > { %2042 = shalt.err (!%p2039_p5)
}
  0x78   : > { %1855 = dma.hbm_to_vmem [thread:$0]  (!%p2395_p6), %s2829_s12, 1024, %s468_s11, [#allocation15], %s2272_s9, %s2272_s9, %s2273_s6  }
  0x79   : > { %s2043_s28 = scalar_lea.hbm %s2820_s3, 1024 }
  0x7a   : > { %p2044_p7 = scmp.ne.s32.totalorder %s2820_s3, %s2043_s28  ;;  %p2050_p1 = scmp.lt.u32.totalorder %s2043_s28, %s2820_s3 }
  0x7c   : > { %p2046_p9 = pnand %p2044_p7, %p2411_p8 }
  0x7e   : > { %p2047_p4 = pneg %p2046_p9 }
  0x80   : > { %p2052_p3 = pnand %p2050_p1, %p2047_p4 }
  0x82   : > { %2055 = shalt.err (!%p2052_p3)
}
  0x83   : > { %s2056_s1 = scalar_lea.vmem %s391_s17, 1024  ;;  %p2064_p13 = scmp.lt.s32.totalorder %s391_s17, %s391_s17 }
  0x84   : > { %p2057_p10 = scmp.ne.s32.totalorder %s391_s17, %s2056_s1  ;;  %p2065_p0 = scmp.lt.s32.totalorder %s2056_s1, %s2056_s1 }
  0x86   : > { %p2059_p11 = pnand %p2057_p10, %p2411_p8  ;;  %p2066_p2 = por %p2065_p0, %p2064_p13 }
  0x88   : > { %p2060_p12 = pneg %p2059_p11 }
  0x8a   : > { %p2067_p5 = pnand %p2066_p2, %p2060_p12 }
  0x8c   : > { %2070 = shalt.err (!%p2067_p5)
}
  0x8d   : > { %1840 = dma.hbm_to_vmem [thread:$0]  (!%p2395_p6), %s2820_s3, 1024, %s391_s17, [#allocation6], %s2272_s9, %s2272_s9, %s2273_s6  }
  0x8e   : > { %s2276_s4 = smov [#allocation10]   ;;  %s2277_s14 = smov [#allocation13]  }
  0x8f   : > { %s422_s5 = sshll.u32 %s2276_s4, 4  ;;  %s451_s27 = sshll.u32 %s2277_s14, 4  ;;  %s423_s5 = int_to_ptr.vmem [resolvable:$true] %s422_s5  ;;  %s452_s27 = int_to_ptr.vmem [resolvable:$true] %s451_s27 }
  0x90   : > { %s2071_s26 = scalar_lea.hbm %s2824_s7, 1024 }
  0x91   : > { %p2072_p7 = scmp.ne.s32.totalorder %s2824_s7, %s2071_s26  ;;  %p2078_p1 = scmp.lt.u32.totalorder %s2071_s26, %s2824_s7 }
  0x93   : > { %p2074_p9 = pnand %p2072_p7, %p2411_p8 }
  0x95   : > { %p2075_p4 = pneg %p2074_p9 }
  0x97   : > { %p2080_p3 = pnand %p2078_p1, %p2075_p4 }
  0x99   : > { %2083 = shalt.err (!%p2080_p3)
}
  0x9a   : > { %s2084_s17 = scalar_lea.vmem %s423_s5, 1024  ;;  %p2092_p13 = scmp.lt.s32.totalorder %s423_s5, %s423_s5 }
  0x9b   : > { %p2085_p10 = scmp.ne.s32.totalorder %s423_s5, %s2084_s17  ;;  %p2093_p0 = scmp.lt.s32.totalorder %s2084_s17, %s2084_s17 }
  0x9d   : > { %p2087_p11 = pnand %p2085_p10, %p2411_p8  ;;  %p2094_p2 = por %p2093_p0, %p2092_p13 }
  0x9f   : > { %p2088_p12 = pneg %p2087_p11 }
  0xa1   : > { %p2095_p5 = pnand %p2094_p2, %p2088_p12 }
  0xa3   : > { %2098 = shalt.err (!%p2095_p5)
}
  0xa4   : > { %1846 = dma.hbm_to_vmem [thread:$0]  (!%p2395_p6), %s2824_s7, 1024, %s423_s5, [#allocation9], %s2272_s9, %s2272_s9, %s2273_s6  }
  0xa5   : > { %s2099_s24 = scalar_lea.hbm %s2827_s10, 1024 }
  0xa6   : > { %p2100_p7 = scmp.ne.s32.totalorder %s2827_s10, %s2099_s24  ;;  %p2106_p1 = scmp.lt.u32.totalorder %s2099_s24, %s2827_s10 }
  0xa8   : > { %p2102_p9 = pnand %p2100_p7, %p2411_p8 }
  0xaa   : > { %p2103_p4 = pneg %p2102_p9 }
  0xac   : > { %p2108_p3 = pnand %p2106_p1, %p2103_p4 }
  0xae   : > { %2111 = shalt.err (!%p2108_p3)
}
  0xaf   : > { %s2112_s11 = scalar_lea.vmem %s452_s27, 1024  ;;  %p2120_p13 = scmp.lt.s32.totalorder %s452_s27, %s452_s27 }
  0xb0   : > { %p2113_p10 = scmp.ne.s32.totalorder %s452_s27, %s2112_s11  ;;  %p2121_p0 = scmp.lt.s32.totalorder %s2112_s11, %s2112_s11 }
  0xb2   : > { %p2115_p11 = pnand %p2113_p10, %p2411_p8  ;;  %p2122_p2 = por %p2121_p0, %p2120_p13 }
  0xb4   : > { %p2116_p12 = pneg %p2115_p11 }
  0xb6   : > { %p2123_p5 = pnand %p2122_p2, %p2116_p12 }
  0xb8   : > { %2126 = shalt.err (!%p2123_p5)
}
  0xb9   : > { %1852 = dma.hbm_to_vmem [thread:$0]  (!%p2395_p6), %s2827_s10, 1024, %s452_s27, [#allocation12], %s2272_s9, %s2272_s9, %s2273_s6  }
  0xba   : > { %s2278_s25 = smov [#allocation16]   ;;  %s2127_s24 = scalar_lea.hbm %s2830_s13, 1024 }
  0xbb   : > { %s480_s4 = sshll.u32 %s2278_s25, 4  ;;  %p2128_p7 = scmp.ne.s32.totalorder %s2830_s13, %s2127_s24  ;;  %s481_s4 = int_to_ptr.vmem [resolvable:$true] %s480_s4 }
  0xbc   : > { %p2134_p1 = scmp.lt.u32.totalorder %s2127_s24, %s2830_s13 }
  0xbd   : > { %p2130_p9 = pnand %p2128_p7, %p2411_p8 }
  0xbf   : > { %p2131_p4 = pneg %p2130_p9 }
  0xc1   : > { %p2136_p3 = pnand %p2134_p1, %p2131_p4 }
  0xc3   : > { %2139 = shalt.err (!%p2136_p3)
}
  0xc4   : > { %s2140_s27 = scalar_lea.vmem %s481_s4, 1024  ;;  %p2148_p13 = scmp.lt.s32.totalorder %s481_s4, %s481_s4 }
  0xc5   : > { %p2141_p10 = scmp.ne.s32.totalorder %s481_s4, %s2140_s27  ;;  %p2149_p0 = scmp.lt.s32.totalorder %s2140_s27, %s2140_s27 }
  0xc7   : > { %p2143_p11 = pnand %p2141_p10, %p2411_p8  ;;  %p2150_p2 = por %p2149_p0, %p2148_p13 }
  0xc9   : > { %p2144_p12 = pneg %p2143_p11 }
  0xcb   : > { %p2151_p5 = pnand %p2150_p2, %p2144_p12 }
  0xcd   : > { %2154 = shalt.err (!%p2151_p5)
}
  0xce   : > { %1858 = dma.hbm_to_vmem [thread:$0]  (!%p2395_p6), %s2830_s13, 1024, %s481_s4, [#allocation15], %s2272_s9, %s2272_s9, %s2273_s6  }
  0xcf   : > { %s1467_s23 = sadd.s32 4294967294, %s2267_s16   ;;  %s2586_s21 = sadd.s32 1, %s2267_s16  }
  0xd0   : > { %s38_s17 = ssub.s32 %s2267_s16, %s2586_s21  ;;  %s41_s25 = sadd.s32 1, %s2263_s15 }
  0xd1   : > { %p39_p8 = scmp.eq.s32.totalorder %s38_s17, 0  ;;  %p48_p7 = scmp.ne.s32.totalorder %s2263_s15, %s2259_s30 }
  0xd2   : > { %p49_p9 = scmp.eq.s32.totalorder %s2267_s16, 0  ;;  %p54_p4 = scmp.ne.s32.totalorder %s2259_s30, %s2255_s29 }
  0xd3   : > { %s2597_s14 = scalar_select %p39_p8, %s2263_s15, %s41_s25  }
  0xd4   : > { %p2599_p1 = por %p49_p9, %p48_p7  ;;  %p2849_p3 = scmp.eq.s32.totalorder %s2381_s19, 0 }
  0xd5   : > { %p351_p10 = scmp.eq.s32.totalorder %s2381_s19, 1  ;;  %p357_p11 = scmp.eq.s32.totalorder %s1467_s23, 1 }
  0xd6   : > { %p2605_p6 = por %p2849_p3, %p54_p4  ;;  %p1875_p12 = scmp.lt.s32.totalorder %s2267_s16, 2 }
  0xd7   : > { %s494_s6 = sand.u32 1, %s2263_s15   ;;  %p2612_p13 = por %p351_p10, %p48_p7 }
  0xd8   : > { %p2616_p0 = por %p357_p11, %p54_p4  ;;  %s1478_s26 = sshll.u32 %s494_s6, 3 }
  0xd9   : > { %s2851_s4 = scalar_select %p2612_p13, 1, 0 }
  0xda   : > { %s2852_s24 = scalar_select %p2616_p0, 1, 0 }
  0xdb   : > { %s1479_s18 = sshll.u32 %s2267_s16, 7  ;;  %s498_s11 = scalar_lea.vmem [#allocation2], %s1478_s26 }
  0xdc   : > { %s2624_s27 = scalar_lea.hbm %s2817_s0, %s1479_s18  ;;  %s505_s5 = sshll.u32 %s498_s11, 4  ;;  %s2626_s5 = int_to_ptr.vmem [resolvable:$true] %s505_s5 }
  0xdd   : > { %p2630_p2 = pnand %p1875_p12, %p2599_p1  ;;  %s495_s17 = scalar_lea.sflag [#allocation3], %s494_s6 }
  0xde   : > { %s2155_s25 = scalar_lea.hbm %s2624_s27, 128  ;;  %s2160_s22 = scalar_lea.hbm %s2817_s0, 256 }
  0xdf   : > { %p2156_p5 = scmp.ne.s32.totalorder %s2624_s27, %s2155_s25  ;;  %p2157_p8 = pneg %p2630_p2 }
  0xe0   : > { %p2161_p4 = scmp.lt.u32.totalorder %s2624_s27, %s2817_s0  ;;  %p2162_p1 = scmp.lt.u32.totalorder %s2160_s22, %s2155_s25 }
  0xe1   : > { %p2158_p7 = pnand %p2157_p8, %p2156_p5  ;;  %p2164_p10 = scmp.lt.u32.totalorder %s2155_s25, %s2624_s27 }
  0xe2   : > { %p2163_p3 = por %p2162_p1, %p2161_p4 }
  0xe3   : > { %p2159_p9 = pneg %p2158_p7 }
  0xe4   : > { %p2165_p11 = por %p2164_p10, %p2163_p3 }
  0xe6   : > { %p2166_p12 = pnand %p2165_p11, %p2159_p9 }
  0xe8   : > { %2169 = shalt.err (!%p2166_p12)
}
  0xe9   : > { %s2170_s6 = scalar_lea.vmem %s2626_s5, 128  ;;  %s2279_s11 = smov [#allocation2]  }
  0xea   : > { %p2171_p5 = scmp.ne.s32.totalorder %s2626_s5, %s2170_s6  ;;  %s2175_s26 = sshll.u32 %s2279_s11, 4  ;;  %s2176_s26 = int_to_ptr.vmem [resolvable:$false] %s2175_s26 }
  0xeb   : > { %s2177_s18 = scalar_lea.vmem %s2176_s26, 256  ;;  %p2178_p13 = scmp.lt.s32.totalorder %s2626_s5, %s2176_s26 }
  0xec   : > { %p2173_p7 = pnand %p2171_p5, %p2157_p8  ;;  %p2179_p4 = scmp.lt.s32.totalorder %s2177_s18, %s2170_s6 }
  0xee   : > { %p2174_p0 = pneg %p2173_p7  ;;  %p2180_p1 = por %p2179_p4, %p2178_p13 }
  0xf0   : > { %p2181_p3 = pnand %p2180_p1, %p2174_p0 }
  0xf2   : > { %2184 = shalt.err (!%p2181_p3)
}
  0xf3   : > { %1862 = dma.hbm_to_vmem [thread:$0]  (!%p2630_p2), %s2624_s27, 128, %s2626_s5, %s495_s17  }
  0xf4   : > { %p2854_p9 = scmp.ne.s32.totalorder %s2843_s20, 0 }
  0xf5   : > { %s2662_s25 = sand.u32 (!%p2854_p9), 1, %s2259_s30  }
  0xf6   : > { %514 = sbr.rel (%p2854_p9) target bundleno = 1529 (0x5f9), region = 76  ;;  %s1481_s22 = sshll.u32 (!%p2854_p9), %s2662_s25, 3 }
  0xf7   : > { %s517_s28 = scalar_lea.sflag (!%p2854_p9), [#allocation3], %s2662_s25  ;;  %s520_s1 = scalar_lea.vmem (!%p2854_p9), [#allocation2], %s1481_s22 }
  0xfd   : > { %2230 = dma.done.wait (%p2605_p6), %s517_s28, 128  }
  0xfe   : > { %2232 = vsyncadd (%p2605_p6), %s517_s28, 4294967168  ;;  %p2855_p13 = scmp.eq.s32.totalorder %s2381_s19, 0 }
 0x100   : > { %2234 = dma.done.wait (%p2855_p13), [#allocation6], 1152   ;;  %p2856_p0 = pmov %p2855_p13 }
 0x102   : > { %2236 = vsyncadd (%p2856_p0), [#allocation6], 4294966144  ;;  %p2857_p2 = pmov %p2856_p0 }
 0x103   : > { %p2858_p8 = pmov %p2856_p0 }
 0x104   : > { %2238 = dma.done.wait (%p2857_p2), [#allocation9], 2048  }
 0x105   : > { %2240 = vsyncadd (%p2858_p8), [#allocation9], 4294965248  ;;  %p2859_p10 = pmov %p2856_p0 }
 0x106   : > { %p2860_p11 = pmov %p2856_p0 }
 0x107   : > { %2242 = dma.done.wait (%p2859_p10), [#allocation12], 2048  }
 0x108   : > { %2244 = vsyncadd (%p2860_p11), [#allocation12], 4294965248  ;;  %p2861_p6 = pmov %p2856_p0 }
 0x109   : > { %p2862_p12 = pmov %p2856_p0 }
 0x10a   : > { %2246 = dma.done.wait (%p2861_p6), [#allocation15], 2048  }
 0x10b   : > { %2248 = vsyncadd (%p2862_p12), [#allocation15], 4294965248  ;;  %v2280_v0 = vmov 0.0   ;;  %vm2281_vm0 = vmmov 0   ;;  %v2282_v1 = vmov 0.0|0.0   ;;  %vm606_vm1 = vcmask 64512  }
 0x10c   : > { %1572 = vmatprep.subr.mxu0 %v2280_v0  ;;  %1574 = vmatprep.mubr.msk.f32.mxu0 %vm2281_vm0, %v2280_v0  ;;  %v598_v2 = vld [vmem:[#allocation5] sm:$0xff]  ;;  %v597_v3 = vld [vmem:[%s520_s1] sm:$0xff]  ;;  %v680_v4 = vld [vmem:[#allocation7] sm:$0xff]  ;;  %vm705_vm2 = vcmask 523264   ;;  %s2863_s23 = sld [smem:[#allocation25_spill]]  ;;  %s2864_s11 = sld [smem:[#allocation27_spill]] }
 0x10d   : > { %1710 = vmatprep.subr.bf16.mxu1 %v2282_v1  ;;  %1593 = vmatprep.mubr.msk.f32.mxu1 %vm2281_vm0, %v2280_v0  ;;  %v681_v5 = vld [vmem:[#allocation7 + $0x8] sm:$0xff]  ;;  %v682_v6 = vld [vmem:[#allocation7 + $0x10] sm:$0xff]  ;;  %v683_v7 = vld [vmem:[#allocation7 + $0x18] sm:$0xff]  ;;  %s2865_s28 = sld [smem:[#allocation28_spill]]  ;;  %s2866_s9 = sld [smem:[#allocation29_spill]] }
 0x10e   : > { %1573 = vmatpush3.msra.mxu0 %v598_v2  ;;  %v1711_v8 = vpack.c.bf16 %v681_v5, %v680_v4  ;;  %v1714_v9 = vpack.c.bf16 %v683_v7, %v682_v6  ;;  %v684_v10 = vld [vmem:[#allocation7 + $0x20] sm:$0xff]  ;;  %v685_v11 = vld [vmem:[#allocation7 + $0x28] sm:$0xff]  ;;  %v686_v13 = vld [vmem:[#allocation7 + $0x30] sm:$0xff]  ;;  %s2283_s27 = smov 64   ;;  %s1504_s5 = sshll.u32 %s2381_s19, 7 }
 0x10f   : > { %1575 = vmatmul.mubr.msk.f32.vlgmr.msra.gmra.mrb[0].mxu0 %vm606_vm1, %v597_v3  ;;  %1722 = vmatprep.subr.bf16.mxu0 %v2282_v1  ;;  %v1717_v12 = vpack.c.bf16 %v685_v11, %v684_v10  ;;  %v687_v14 = vld [vmem:[#allocation7 + $0x38] sm:$0xff]  ;;  %v689_v16 = vld [vmem:[#allocation8] sm:$0xff]  ;;  %v690_v17 = vld [vmem:[#allocation8 + $0x8] sm:$0xff]  ;;  %s2867_s26 = sld [smem:[#allocation30_spill]]  ;;  %p2868_p7 = scmp.ne.s32.totalorder %s2851_s4, 0 }
 0x110   : > { %1612 = vmatprep.mubr.msk.f32.mxu0 %vm2281_vm0, %v2280_v0  ;;  %1712 = vmatpush3.bf16.msra.mxu1 %v1711_v8  ;;  %v1720_v15 = vpack.c.bf16 %v687_v14, %v686_v13  ;;  %v691_v18 = vld [vmem:[#allocation8 + $0x10] sm:$0xff]  ;;  %v1723_v19 = vpack.c.bf16 %v690_v17, %v689_v16  ;;  %v692_v20 = vld [vmem:[#allocation8 + $0x18] sm:$0xff]  ;;  %v693_v22 = vld [vmem:[#allocation8 + $0x20] sm:$0xff]  ;;  %s2284_s19 = smov [#allocation17]  }
 0x111   : > { %1713 = vmatprep.subr.bf16.mxu1 %v2282_v1  ;;  %v1726_v21 = vpack.c.bf16 %v692_v20, %v691_v18  ;;  %v694_v23 = vld [vmem:[#allocation8 + $0x28] sm:$0xff]  ;;  %v695_v30 = vld [vmem:[#allocation8 + $0x30] sm:$0xff]  ;;  %v696_v31 = vld [vmem:[#allocation8 + $0x38] sm:$0xff] }
 0x112   : > { %1724 = vmatpush3.bf16.msra.mxu0 %v1723_v19  ;;  %v1729_v24 = vpack.c.bf16 %v694_v23, %v693_v22  ;;  %v1491_v25 = vld [vmem:[%s2819_s2] ss:$0 sm:$0xff]  ;;  %v1732_v32 = vpack.c.bf16 %v696_v31, %v695_v30  ;;  %v867_v34 = vld [vmem:[#allocation10] sm:$0xff]  ;;  %v869_v41 = vld [vmem:[#allocation10 + $0x10] sm:$0xff] }
 0x113   : > { %1725 = vmatprep.subr.bf16.mxu0 %v2282_v1  ;;  %v1493_v33 = vld [vmem:[%s2863_s23] ss:$0 sm:$0xff]  ;;  %v870_v42 = vld [vmem:[#allocation10 + $0x18] sm:$0xff]  ;;  %v871_v44 = vld [vmem:[#allocation10 + $0x20] sm:$0xff]  ;;  %s596_s23 = scalar_lea.vmem [#allocation17], %s1481_s22  ;;  %s2189_s22 = sshll.u32 %s2284_s19, 4  ;;  %s2190_s22 = int_to_ptr.vmem [resolvable:$false] %s2189_s22 }
 0x114   : > { %1715 = vmatpush3.bf16.msra.mxu1 %v1714_v9  ;;  %v868_v35 = vld [vmem:[#allocation10 + $0x8] sm:$0xff]  ;;  %v1750_v43 = vpack.c.bf16 %v870_v42, %v869_v41  ;;  %v873_v47 = vld [vmem:[#allocation10 + $0x30] sm:$0xff]  ;;  %v874_v48 = vld [vmem:[#allocation10 + $0x38] sm:$0xff]  ;;  %s1321_s17 = sshll.u32 %s596_s23, 4  ;;  %s2191_s20 = scalar_lea.vmem %s2190_s22, 256  ;;  %s2774_s17 = int_to_ptr.vmem [resolvable:$true] %s1321_s17 }
 0x115   : > { %1716 = vmatprep.subr.bf16.mxu1 %v2282_v1  ;;  %v1747_v39 = vpack.c.bf16 %v868_v35, %v867_v34  ;;  %v872_v45 = vld [vmem:[#allocation10 + $0x28] sm:$0xff]  ;;  %v1756_v49 = vpack.c.bf16 %v874_v48, %v873_v47  ;;  %v875_v50 = vld [vmem:[#allocation11] sm:$0xff]  ;;  %v877_v53 = vld [vmem:[#allocation11 + $0x10] sm:$0xff]  ;;  %s2772_s18 = scalar_lea.hbm %s2867_s26, %s1504_s5  ;;  %s2185_s1 = scalar_lea.vmem %s2774_s17, 128 }
 0x116   : > { %1727 = vmatpush3.bf16.msra.mxu0 %v1726_v21  ;;  %v1753_v46 = vpack.c.bf16 %v872_v45, %v871_v44  ;;  %v876_v51 = vld [vmem:[#allocation11 + $0x8] sm:$0xff]  ;;  %v878_v54 = vld [vmem:[#allocation11 + $0x18] sm:$0xff]  ;;  %v879_v56 = vld [vmem:[#allocation11 + $0x20] sm:$0xff]  ;;  %p2186_p5 = scmp.ne.s32.totalorder %s2774_s17, %s2185_s1  ;;  %p2192_p3 = scmp.lt.s32.totalorder %s2774_s17, %s2190_s22 }
 0x117   : > { %1728 = vmatprep.subr.bf16.mxu0 %v2282_v1  ;;  %v1735_v52 = vpack.c.bf16 %v876_v51, %v875_v50  ;;  %v1738_v55 = vpack.c.bf16 %v878_v54, %v877_v53  ;;  %v880_v57 = vld [vmem:[#allocation11 + $0x28] sm:$0xff]  ;;  %v881_v59 = vld [vmem:[#allocation11 + $0x30] sm:$0xff]  ;;  %v882_v60 = vld [vmem:[#allocation11 + $0x38] sm:$0xff]  ;;  %p2193_p9 = scmp.lt.s32.totalorder %s2191_s20, %s2185_s1 }
 0x118   : > { %1718 = vmatpush3.bf16.msra.mxu1 %v1717_v12  ;;  %v1741_v58 = vpack.c.bf16 %v880_v57, %v879_v56  ;;  %v1744_v61 = vpack.c.bf16 %v882_v60, %v881_v59  ;;  %v1495_v62 = vld [vmem:[%s2864_s11] ss:$0 sm:$0xff]  ;;  %v901_v4 = vld [vmem:[#allocation16] sm:$0xff]  ;;  %v903_v10 = vld [vmem:[#allocation16 + $0x10] sm:$0xff]  ;;  %p2187_p4 = pnand %p2186_p5, %p2868_p7 }
 0x119   : > { %1719 = vmatprep.subr.bf16.mxu1 %v2282_v1  ;;  %v902_v5 = vld [vmem:[#allocation16 + $0x8] sm:$0xff]  ;;  %v904_v11 = vld [vmem:[#allocation16 + $0x18] sm:$0xff]  ;;  %v907_v20 = vld [vmem:[#allocation16 + $0x30] sm:$0xff]  ;;  %p2194_p13 = por %p2193_p9, %p2192_p3 }
 0x11a   : > { %1730 = vmatpush3.bf16.msra.mxu0 %v1729_v24  ;;  %v1771_v7 = vpack.c.bf16 %v902_v5, %v901_v4  ;;  %v1774_v14 = vpack.c.bf16 %v904_v11, %v903_v10  ;;  %v906_v16 = vld [vmem:[#allocation16 + $0x28] sm:$0xff]  ;;  %v908_v21 = vld [vmem:[#allocation16 + $0x38] sm:$0xff]  ;;  %v890_v35 = vld [vmem:[#allocation13 + $0x30] sm:$0xff]  ;;  %p2188_p1 = pneg %p2187_p4 }
 0x11b   : > { %1731 = vmatprep.subr.bf16.mxu0 %v2282_v1  ;;  %v1780_v24 = vpack.c.bf16 %v908_v21, %v907_v20  ;;  %v887_v30 = vld [vmem:[#allocation13 + $0x18] sm:$0xff]  ;;  %v883_v42 = vld [vmem:[%s2865_s28] sm:$0x1]  ;;  %v895_v56 = vld [vmem:[#allocation14 + $0x10] sm:$0xff]  ;;  %s1308_s28 = scalar_lea.sflag [#allocation4], %s2662_s25 }
 0x11c   : > { %1721 = vmatpush3.bf16.msra.mxu1 %v1720_v15  ;;  %v905_v15 = vld [vmem:[#allocation16 + $0x20] sm:$0xff]  ;;  %v894_v50 = vld [vmem:[#allocation14 + $0x8] sm:$0xff]  ;;  %v896_v57 = vld [vmem:[#allocation14 + $0x18] sm:$0xff]  ;;  %p2195_p0 = pnand %p2194_p13, %p2188_p1 }
 0x11d   : > { %1734 = vmatprep.subr.bf16.mxu1 %v2282_v1  ;;  %v1777_v19 = vpack.c.bf16 %v906_v16, %v905_v15  ;;  %v897_v59 = vld [vmem:[#allocation14 + $0x20] sm:$0xff]  ;;  %v898_v60 = vld [vmem:[#allocation14 + $0x28] sm:$0xff] }
 0x11e   : > { %1733 = vmatpush3.bf16.msra.mxu0 %v1732_v32  ;;  %v888_v32 = vld [vmem:[#allocation13 + $0x20] sm:$0xff] }
 0x11f   : > { %1746 = vmatprep.subr.bf16.mxu0 %v2282_v1 }
 0x1e2   : > { %v676_v26 = vpop.f32.mrb[0].mxu0 }
 0x1e3   : > { %v2707_v27 = vadd.f32 %v1491_v25, %v676_v26  ;;  %v1576_v28 = vpop.f32.mrb[1].mxu0  ;;  %v884_v26 = vld [vmem:[#allocation13] sm:$0xff] }
 0x1e4   : > { %v886_v28 = vld [vmem:[#allocation13 + $0x10] sm:$0xff] }
 0x1e5   : > { %v698_v29 = vmax.f32 %v2707_v27, 0.0  ;;  %v1762_v31 = vpack.c.bf16 %v887_v30, %v886_v28 }
 0x1e7   : > { %1594 = vmatmul.mubr.msk.f32.vlgmr.msra.gmra.mrb[0].mxu1 %vm705_vm2, %v698_v29 }
 0x1e8   : > { %1631 = vmatprep.mubr.msk.f32.mxu1 %vm2281_vm0, %v2280_v0  ;;  %1736 = vmatpush3.bf16.msra.mxu1 %v1735_v52 }
 0x1e9   : > { %1737 = vmatprep.subr.bf16.mxu1 %v2282_v1 }
 0x1ec   : > { %1739 = vmatpush3.bf16.msra.mxu1 %v1738_v55 }
 0x1ed   : > { %1740 = vmatprep.subr.bf16.mxu1 %v2282_v1 }
 0x1f0   : > { %1742 = vmatpush3.bf16.msra.mxu1 %v1741_v58  ;;  %v1786_v58 = vpack.c.bf16 %v896_v57, %v895_v56 }
 0x1f1   : > { %1743 = vmatprep.subr.bf16.mxu1 %v2282_v1 }
 0x1f4   : > { %1745 = vmatpush3.bf16.msra.mxu1 %v1744_v61  ;;  %v1789_v61 = vpack.c.bf16 %v898_v60, %v897_v59 }
 0x1f5   : > { %1758 = vmatprep.subr.bf16.mxu1 %v2282_v1 }
 0x2ba   : > { %v775_v36 = vpop.f32.mrb[0].mxu1 }
 0x2bb   : > { %v776_v37 = vadd.f32 %v1493_v33, %v775_v36  ;;  %v1595_v38 = vpop.f32.mrb[1].mxu1  ;;  %v889_v33 = vld [vmem:[#allocation13 + $0x28] sm:$0xff]  ;;  %v891_v36 = vld [vmem:[#allocation13 + $0x38] sm:$0xff] }
 0x2bc   : > { %v1765_v34 = vpack.c.bf16 %v889_v33, %v888_v32 }
 0x2bd   : > { %v779_v40 = vmax.f32 %v776_v37, 0.0  ;;  %v1768_v37 = vpack.c.bf16 %v891_v36, %v890_v35 }
 0x2bf   : > { %1613 = vmatmul.mubr.msk.f32.vlgmr.msra.gmra.mrb[2].mxu0 %vm705_vm2, %v779_v40  ;;  %v1057_v40 = vlaneseq }
 0x2c0   : > { %1748 = vmatpush3.bf16.msra.mxu0 %v1747_v39  ;;  %1650 = vmatprep.mubr.msk.f32.mxu0 %vm2281_vm0, %v2280_v0 }
 0x2c1   : > { %1749 = vmatprep.subr.bf16.mxu0 %v2282_v1  ;;  %v1058_v41 = vshrl.u32 %v1057_v40, 7 }
 0x2c4   : > { %1751 = vmatpush3.bf16.msra.mxu0 %v1750_v43  ;;  %v1059_v43 = vsub.s32 0, %v1058_v41 }
 0x2c5   : > { %1752 = vmatprep.subr.bf16.mxu0 %v2282_v1 }
 0x2c8   : > { %1754 = vmatpush3.bf16.msra.mxu0 %v1753_v46 }
 0x2c9   : > { %1755 = vmatprep.subr.bf16.mxu0 %v2282_v1 }
 0x2cc   : > { %1757 = vmatpush3.bf16.msra.mxu0 %v1756_v49  ;;  %v893_v49 = vld [vmem:[#allocation14] sm:$0xff] }
 0x2cd   : > { %1770 = vmatprep.subr.bf16.mxu0 %v2282_v1  ;;  %v1783_v54 = vpack.c.bf16 %v894_v50, %v893_v49 }
 0x392   : > { %v855_v63 = vpop.f32.mrb[2].mxu0 }
 0x393   : > { %v856_v2 = vadd.f32 %v1495_v62, %v855_v63  ;;  %v1614_v3 = vpop.f32.mrb[3].mxu0  ;;  %v899_v62 = vld [vmem:[#allocation14 + $0x30] sm:$0xff]  ;;  %v900_v63 = vld [vmem:[#allocation14 + $0x38] sm:$0xff] }
 0x395   : > { %v2732_v6 = vadd.f32 %v856_v2, %v2707_v27  ;;  %v885_v27 = vld [vmem:[#allocation13 + $0x8] sm:$0xff]  ;;  %v1792_v2 = vpack.c.bf16 %v900_v63, %v899_v62 }
 0x396   : > { %v1759_v29 = vpack.c.bf16 %v885_v27, %v884_v26 }
 0x397   : > { %v860_v8 = vsel %vm705_vm2, %v2732_v6, -inf  ;;  %v983_v9 = vmax.f32 %v2732_v6, 0.0 }
 0x398   : > { %v861_v12 = vrot.slane %v860_v8, 4 }
 0x399   : > { %1651 = vmatmul.mubr.msk.f32.vlgmr.msra.gmra.mrb[4].mxu0 %vm705_vm2, %v983_v9 }
 0x39a   : > { %v862_v13 = vmax.f32 %v860_v8, %v861_v12  ;;  %1772 = vmatpush3.bf16.msra.mxu0 %v1771_v7  ;;  %1688 = vmatprep.mubr.msk.f32.mxu0 %vm2281_vm0, %v2280_v0 }
 0x39b   : > { %1773 = vmatprep.subr.bf16.mxu0 %v2282_v1 }
 0x39c   : > { %v863_v17 = vrot.slane %v862_v13, 2 }
 0x39e   : > { %v864_v18 = vmax.f32 %v862_v13, %v863_v17  ;;  %1775 = vmatpush3.bf16.msra.mxu0 %v1774_v14 }
 0x39f   : > { %1776 = vmatprep.subr.bf16.mxu0 %v2282_v1 }
 0x3a0   : > { %v865_v22 = vrot.slane %v864_v18, 1 }
 0x3a2   : > { %v866_v23 = vmax.f32 %v864_v18, %v865_v22  ;;  %1778 = vmatpush3.bf16.msra.mxu0 %v1777_v19 }
 0x3a3   : > { %1779 = vmatprep.subr.bf16.mxu0 %v2282_v1 }
 0x3a4   : > { %v909_v25 = vmax.f32 %v866_v23, 0.0 }
 0x3a6   : > { %1781 = vmatpush3.bf16.msra.mxu0 %v1780_v24  ;;  %1632 = vmatmul.mubr.msk.f32.vlgmr.msra.gmra.mrb[2].mxu1 %vm705_vm2, %v909_v25 }
 0x3a7   : > { %1669 = vmatprep.mubr.msk.f32.mxu1 %vm2281_vm0, %v2280_v0  ;;  %1760 = vmatpush3.bf16.msra.mxu1 %v1759_v29 }
 0x3a8   : > { %1761 = vmatprep.subr.bf16.mxu1 %v2282_v1 }
 0x3a9   : > { %1689 = vmatmul.mubr.msk.f32.vlgmr.msra.gmra.mrb[6].mxu0 %vm705_vm2, %v866_v23 }
 0x3ab   : > { %1763 = vmatpush3.bf16.msra.mxu1 %v1762_v31 }
 0x3ac   : > { %1764 = vmatprep.subr.bf16.mxu1 %v2282_v1 }
 0x3af   : > { %1766 = vmatpush3.bf16.msra.mxu1 %v1765_v34 }
 0x3b0   : > { %1767 = vmatprep.subr.bf16.mxu1 %v2282_v1 }
 0x3b3   : > { %1769 = vmatpush3.bf16.msra.mxu1 %v1768_v37 }
 0x3b4   : > { %1782 = vmatprep.subr.bf16.mxu1 %v2282_v1 }
 0x46c   : > { %v1053_v38 = vpop.f32.mrb[4].mxu0 }
 0x46d   : > { %v1652_v39 = vpop.f32.mrb[5].mxu0 }
 0x479   : > { %v979_v44 = vpop.f32.mrb[2].mxu1 }
 0x47a   : > { %v980_v45 = vadd.f32 %v979_v44, %v883_v42  ;;  %v1633_v46 = vpop.f32.mrb[3].mxu1 }
 0x47c   : > { %v1060_v47 = vrot.slane %v980_v45, %v1059_v43  ;;  %v1211_v48 = vpop.f32.mrb[6].mxu0 }
 0x47d   : > { %v1291_v51 = vrot.slane %v1211_v48, %v1059_v43  ;;  %v1690_v52 = vpop.f32.mrb[7].mxu0 }
 0x47e   : > { %v1061_v53 = vadd.f32 %v1060_v47, %v1053_v38 }
 0x480   : > { %v1062_v55 = vmax.f32 %v1061_v53, 0.0 }
 0x482   : > { %1670 = vmatmul.mubr.msk.f32.vlgmr.msra.gmra.mrb[4].mxu1 %vm705_vm2, %v1062_v55 }
 0x483   : > { %1784 = vmatpush3.bf16.msra.mxu1 %v1783_v54  ;;  %1707 = vmatprep.mubr.msk.f32.mxu1 %vm2281_vm0, %v2280_v0  ;;  %v1499_v0 = vld [vmem:[%s2866_s9] ss:$0 sm:$0xff] }
 0x484   : > { %1785 = vmatprep.subr.bf16.mxu1 %v2282_v1 }
 0x487   : > { %1787 = vmatpush3.bf16.msra.mxu1 %v1786_v58 }
 0x488   : > { %1788 = vmatprep.subr.bf16.mxu1 %v2282_v1 }
 0x48b   : > { %1790 = vmatpush3.bf16.msra.mxu1 %v1789_v61 }
 0x48c   : > { %1791 = vmatprep.subr.bf16.mxu1 %v2282_v1 }
 0x48f   : > { %1793 = vmatpush3.bf16.msra.mxu1 %v1792_v2 }
 0x492   : > { %1708 = vmatmul.mubr.msk.f32.vlgmr.msra.gmra.mrb[4].mxu1 %vm705_vm2, %v2732_v6 }
 0x565   : > { %v1284_v3 = vpop.f32.mrb[4].mxu1 }
 0x566   : > { %v1794_v4 = vadd.f32 %v1499_v0, %v1284_v3  ;;  %v1709_v5 = vpop.f32.mrb[5].mxu1 }
 0x568   : > { %v1795_v7 = vadd.f32 %v1794_v4, %v1291_v51 }
 0x56a   : > { %v1294_v8 = vsel %vm705_vm2, %v1795_v7, -inf }
 0x56b   : > { %v1295_v9 = vrot.slane %v1294_v8, 4 }
 0x56d   : > { %v1296_v10 = vmax.f32 %v1294_v8, %v1295_v9 }
 0x56f   : > { %v1297_v1 = vrot.slane %v1296_v10, 2 }
 0x571   : > { %v1298_v11 = vmax.f32 %v1296_v10, %v1297_v1 }
 0x573   : > { %v1299_v12 = vrot.slane %v1298_v11, 1 }
 0x575   : > { %v1300_v13 = vmax.f32 %v1298_v11, %v1299_v12 }
 0x577   : > { %1302 = vrot.lane.b32.xlu0 %v1300_v13, %s2283_s27 }
 0x5e9   : > { %v1303_v6 = vpop.permute.xlu0 %1302 }
 0x5ea   : > { %v1305_v14 = vsel %vm705_vm2, %v1795_v7, %v1303_v6 }
 0x5eb   : > { %1306 = vst [vmem:[%s596_s23] sm:$0xff] %v1305_v14 }
 0x5ec   : > { %2198 = shalt.err (!%p2195_p0)
}
 0x5ed   : > { %s2199_s25 = scalar_lea.hbm %s2772_s18, 128  ;;  %s2203_s5 = scalar_lea.hbm %s2867_s26, 256 }
 0x5ee   : > { %p2200_p2 = scmp.ne.s32.totalorder %s2772_s18, %s2199_s25  ;;  %p2204_p11 = scmp.lt.u32.totalorder %s2772_s18, %s2867_s26 }
 0x5ef   : > { %p2205_p6 = scmp.lt.u32.totalorder %s2203_s5, %s2199_s25  ;;  %p2207_p5 = scmp.lt.u32.totalorder %s2199_s25, %s2772_s18 }
 0x5f0   : > { %p2201_p8 = pnand %p2200_p2, %p2868_p7 }
 0x5f1   : > { %p2206_p12 = por %p2205_p6, %p2204_p11 }
 0x5f2   : > { %p2202_p10 = pneg %p2201_p8 }
 0x5f3   : > { %p2208_p4 = por %p2207_p5, %p2206_p12 }
 0x5f5   : > { %p2209_p1 = pnand %p2208_p4, %p2202_p10 }
 0x5f7   : > { %2212 = shalt.err (!%p2209_p1)
}
 0x5f8   : > { %1832 = dma.vmem_to_hbm [thread:$0]  (%p2868_p7), %s2774_s17, 128, %s2772_s18, %s1308_s28  }
 0x5f9 PF: > { %s1333_s11 = sand.u32 1, %s2255_s29   ;;  %p2869_p3 = scmp.ne.s32.totalorder %s2852_s24, 0 }
 0x5fa   : > { %p2870_p9 = scmp.ge.s32.totalorder %s2267_s16, 2  ;;  %s1334_s1 = scalar_lea.sflag [#allocation4], %s1333_s11 }
 0x5fc   : > { %p1864_p13 = pnand %p2870_p9, %p2869_p3 }
 0x5fe   : > { %2250 = dma.done.wait (!%p1864_p13), %s1334_s1, 128  }
 0x5ff   : > { %2252 = vsyncadd (!%p1864_p13), %s1334_s1, 4294967168  ;;  %p31_p0 = scmp.ge.s32.totalorder %s2586_s21, 4   ;;  %s2871_s29 = smov %s2259_s30 }
 0x600   : > { %s2872_s30 = smov %s2263_s15  ;;  %s2873_s15 = smov %s2597_s14 }
 0x601   : > { %s2874_s16 = smov %s2586_s21  ;;  %33 = sbr.rel (!%p31_p0) target bundleno = 17 (0x11), region = 153 }
 0x608   :  { %1339 = vsyncpa [#allocation3], 1 }
 0x609   :  { %1341 = vsyncpa [#allocation3 + $0x1], 1 }
 0x60a   :  { %1342 = vsyncpa [#allocation6], 1 }
 0x60b   :  { %1343 = vsyncpa [#allocation9], 1 }
 0x60c   :  { %1344 = vsyncpa [#allocation12], 1 }
 0x60d   :  { %1345 = vsyncpa [#allocation15], 1 }
 0x60e   :  { %1346 = vsyncpa [#allocation4], 1 }
 0x60f   :  { %1348 = vsyncpa [#allocation4 + $0x1], 1 }

</bundles_post_ra>
